<compile_context>
chip_gen: v7x
topology: tpu7x:2x2x1
jax: 0.10.0
libtpu: 0.0.40
codegen_flags: <defaults>
</compile_context>

<pallas_src>
import functools

import jax
import jax.numpy as jnp
from jax.experimental import pallas as pl
from jax.experimental.pallas import tpu as pltpu

# ---- synthetic "config" (shapes only; deterministic, no checkpoint) ----
CONFIG = {
    "BVAE_latent": 32,
    "agent_hidden": 32,
    "action_dim": 8,
    "max_action": 1.0,
    "min_action": -1.0,
}

LANE = 128          # lane width: output feature dim is padded to this (dense stores)
SUBLANE_BF16 = 16   # bf16 sublane packing: keep batch tiles a multiple of this


def _round_up(x, m):
    return ((x + m - 1) // m) * m


def actor_kernel(state_ref, w1_ref, b1_ref, w2_ref, b2_ref, w3_ref, b3_ref,
                 out_ref, *, scale, offset):
    """One batch tile of the Actor MLP.

    state_ref : (TB, L)     bf16   (tiled over the batch grid)
    wN_ref    : (in, out)   bf16   (resident across the grid)
    bN_ref    : (1, out)    f32    (resident across the grid)
    out_ref   : (TB, LANE)  f32    (lane-dense; real actions in [:, :action_dim])
    """
    x = state_ref[...]

    # l1 + ReLU  (MXU bf16 matmul, f32 accumulate; bias/ReLU on VPU slots)
    h1 = jnp.dot(x, w1_ref[...], preferred_element_type=jnp.float32)
    h1 = jnp.maximum(h1 + b1_ref[...], 0.0)

    # l2 + ReLU
    h2 = jnp.dot(h1.astype(jnp.bfloat16), w2_ref[...],
                 preferred_element_type=jnp.float32)
    h2 = jnp.maximum(h2 + b2_ref[...], 0.0)

    # l3 + scaled sigmoid  (sigmoid on EUP; action bounds baked as constants)
    logits = jnp.dot(h2.astype(jnp.bfloat16), w3_ref[...],
                     preferred_element_type=jnp.float32)
    logits = logits + b3_ref[...]
    out_ref[...] = scale * jax.nn.sigmoid(logits) + offset


def actor_forward(state, params, *, max_action, min_action, batch_tile=512):
    """Wrapper: batch-tiled grid, resident bf16 weights, lane-dense f32 output."""
    w1, b1, w2, b2, w3, b3 = params
    batch = state.shape[0]
    latent, hidden = w1.shape
    action_dim = w3.shape[1]

    # --- wrapper-side layout prep (one-time cost, plain XLA ops) -----------
    w1b = w1.astype(jnp.bfloat16)
    w2b = w2.astype(jnp.bfloat16)
    # lane-dense output: zero-pad the final layer to LANE output columns.
    w3p = jnp.zeros((hidden, LANE), jnp.bfloat16).at[:, :action_dim].set(
        w3.astype(jnp.bfloat16))
    b3p = jnp.zeros((1, LANE), jnp.float32).at[:, :action_dim].set(
        b3.astype(jnp.float32))
    b1f = b1.astype(jnp.float32)
    b2f = b2.astype(jnp.float32)

    # batch tiling: multiple of the bf16 sublane group; pipelined over a grid.
    tb = min(batch_tile, _round_up(batch, SUBLANE_BF16))
    padded = _round_up(batch, tb)
    xs = state.astype(jnp.bfloat16)
    if padded != batch:
        xs = jnp.pad(xs, ((0, padded - batch), (0, 0)))
    grid = (padded // tb,)

    scale = float(max_action) - float(min_action)
    offset = float(min_action)
    kernel = functools.partial(actor_kernel, scale=scale, offset=offset)

    def resident(shape):
        # weights/biases: same block at every grid step -> stay in VMEM.
        return pl.BlockSpec(shape, lambda i: (0, 0))

    out = pl.pallas_call(
        kernel,
        out_shape=jax.ShapeDtypeStruct((padded, LANE), jnp.float32),
        grid_spec=pltpu.PrefetchScalarGridSpec(
            num_scalar_prefetch=0,
            grid=grid,
            in_specs=[
                pl.BlockSpec((tb, latent), lambda i: (i, 0)),  # state (tiled)
                resident((latent, hidden)),                    # w1
                resident((1, hidden)),                         # b1
                resident((hidden, hidden)),                    # w2
                resident((1, hidden)),                         # b2
                resident((hidden, LANE)),                      # w3 (lane-padded)
                resident((1, LANE)),                           # b3 (lane-padded)
            ],
            out_specs=pl.BlockSpec((tb, LANE), lambda i: (i, 0)),
        ),
        compiler_params=pltpu.CompilerParams(
            # batch tiles are independent -> shard across TCs on v7x (no-op v5e/v6e)
            dimension_semantics=("parallel",),
        ),
    )(xs, w1b, b1f, w2b, b2f, w3p, b3p)

    # strip batch padding and the lane padding of the output slab.
    return out[:batch, :action_dim]


def init_params(key, latent, hidden, action_dim):
    """Deterministic init mimicking PyTorch nn.Linear default (uniform +/- 1/sqrt(fan_in)).
    Weights are stored as (in, out) — transposed relative to PyTorch's (out, in)."""
    ks = jax.random.split(key, 6)

    def lin(kw, kb, fan_in, fan_out):
        bound = 1.0 / jnp.sqrt(fan_in)
        w = jax.random.uniform(kw, (fan_in, fan_out), jnp.float32, -bound, bound)
        b = jax.random.uniform(kb, (1, fan_out), jnp.float32, -bound, bound)
        return w, b

    w1, b1 = lin(ks[0], ks[1], latent, hidden)
    w2, b2 = lin(ks[2], ks[3], hidden, hidden)
    w3, b3 = lin(ks[4], ks[5], hidden, action_dim)
    return (w1, b1, w2, b2, w3, b3)


def actor_forward_ref(state, params, *, max_action, min_action):
    """Pure-JAX reference mirroring the kernel's bf16-operand / f32-accumulate math."""
    w1, b1, w2, b2, w3, b3 = params
    xb = state.astype(jnp.bfloat16)
    h = jnp.dot(xb, w1.astype(jnp.bfloat16), preferred_element_type=jnp.float32)
    h = jnp.maximum(h + b1, 0.0)
    h = jnp.dot(h.astype(jnp.bfloat16), w2.astype(jnp.bfloat16),
                preferred_element_type=jnp.float32)
    h = jnp.maximum(h + b2, 0.0)
    logits = jnp.dot(h.astype(jnp.bfloat16), w3.astype(jnp.bfloat16),
                     preferred_element_type=jnp.float32) + b3
    return (max_action - min_action) * jax.nn.sigmoid(logits) + min_action


if __name__ == "__main__":
    key = jax.random.PRNGKey(0)
    k_param, k_state = jax.random.split(key)

    latent = CONFIG["BVAE_latent"]
    hidden = CONFIG["agent_hidden"]
    action_dim = CONFIG["action_dim"]
    max_action = CONFIG["max_action"]
    min_action = CONFIG["min_action"]
    batch = 4

    params = init_params(k_param, latent, hidden, action_dim)
    state = jax.random.normal(k_state, (batch, latent), dtype=jnp.float32)

    out = actor_forward(state, params, max_action=max_action, min_action=min_action)
    out = jax.block_until_ready(out)

    ref = actor_forward_ref(state, params, max_action=max_action, min_action=min_action)
    assert out.shape == (batch, action_dim), out.shape
    assert jnp.allclose(out, ref, atol=5e-3, rtol=5e-3), \
        float(jnp.max(jnp.abs(out - ref)))

    print("KERNEL_OK")
</pallas_src>

<mosaic_0001>
module attributes {stable_mosaic.version = 11 : i64} {
  func.func @actor_kernel(%arg0: i32, %arg1: memref<16x32xbf16, #tpu.memory_space<vmem>>, %arg2: memref<32x32xbf16, #tpu.memory_space<vmem>>, %arg3: memref<1x32xf32, #tpu.memory_space<vmem>>, %arg4: memref<32x32xbf16, #tpu.memory_space<vmem>>, %arg5: memref<1x32xf32, #tpu.memory_space<vmem>>, %arg6: memref<32x128xbf16, #tpu.memory_space<vmem>>, %arg7: memref<1x128xf32, #tpu.memory_space<vmem>>, %arg8: memref<16x128xf32, #tpu.memory_space<vmem>>) attributes {dimension_semantics = [#tpu.dimension_semantics<parallel>], iteration_bounds = array<i64: 1>, scalar_prefetch = 0 : i64, scratch_operands = 0 : i64, tpu.core_type = #tpu.core_type<tc>, window_params = [{transform_indices = @transform_0, window_bounds = array<i64: 16, 32>}, {pipeline_mode = #tpu.pipeline_mode<synchronous>, transform_indices = @transform_1, window_bounds = array<i64: 32, 32>}, {pipeline_mode = #tpu.pipeline_mode<synchronous>, transform_indices = @transform_2, window_bounds = array<i64: 1, 32>}, {pipeline_mode = #tpu.pipeline_mode<synchronous>, transform_indices = @transform_3, window_bounds = array<i64: 32, 32>}, {pipeline_mode = #tpu.pipeline_mode<synchronous>, transform_indices = @transform_4, window_bounds = array<i64: 1, 32>}, {pipeline_mode = #tpu.pipeline_mode<synchronous>, transform_indices = @transform_5, window_bounds = array<i64: 32, 128>}, {pipeline_mode = #tpu.pipeline_mode<synchronous>, transform_indices = @transform_6, window_bounds = array<i64: 1, 128>}, {transform_indices = @transform_7, window_bounds = array<i64: 16, 128>}]} {
    %c0 = arith.constant 0 : index
    %c0_0 = arith.constant 0 : index
    %0 = vector.load %arg1[%c0, %c0_0] : memref<16x32xbf16, #tpu.memory_space<vmem>>, vector<16x32xbf16>
    %c0_1 = arith.constant 0 : index
    %c0_2 = arith.constant 0 : index
    %1 = vector.load %arg2[%c0_1, %c0_2] : memref<32x32xbf16, #tpu.memory_space<vmem>>, vector<32x32xbf16>
    %cst = arith.constant dense<0.000000e+00> : vector<16x32xf32>
    %2 = tpu.matmul %0, %1, %cst {dimension_numbers = #tpu.dot_dimension_numbers<[1], [0], [0], [1], [0, 0, 1, 1], [], []>} : vector<16x32xbf16>, vector<32x32xbf16>, vector<16x32xf32> -> vector<16x32xf32>
    %c0_3 = arith.constant 0 : index
    %c0_4 = arith.constant 0 : index
    %3 = vector.load %arg3[%c0_3, %c0_4] : memref<1x32xf32, #tpu.memory_space<vmem>>, vector<1x32xf32>
    %4 = vector.broadcast %3 : vector<1x32xf32> to vector<16x32xf32>
    %5 = arith.addf %2, %4 : vector<16x32xf32>
    %cst_5 = arith.constant 0.000000e+00 : f32
    %6 = vector.broadcast %cst_5 : f32 to vector<16x32xf32>
    %7 = arith.maximumf %5, %6 : vector<16x32xf32>
    %8 = arith.truncf %7 : vector<16x32xf32> to vector<16x32xbf16>
    %c0_6 = arith.constant 0 : index
    %c0_7 = arith.constant 0 : index
    %9 = vector.load %arg4[%c0_6, %c0_7] : memref<32x32xbf16, #tpu.memory_space<vmem>>, vector<32x32xbf16>
    %cst_8 = arith.constant dense<0.000000e+00> : vector<16x32xf32>
    %10 = tpu.matmul %8, %9, %cst_8 {dimension_numbers = #tpu.dot_dimension_numbers<[1], [0], [0], [1], [0, 0, 1, 1], [], []>} : vector<16x32xbf16>, vector<32x32xbf16>, vector<16x32xf32> -> vector<16x32xf32>
    %c0_9 = arith.constant 0 : index
    %c0_10 = arith.constant 0 : index
    %11 = vector.load %arg5[%c0_9, %c0_10] : memref<1x32xf32, #tpu.memory_space<vmem>>, vector<1x32xf32>
    %12 = vector.broadcast %11 : vector<1x32xf32> to vector<16x32xf32>
    %13 = arith.addf %10, %12 : vector<16x32xf32>
    %cst_11 = arith.constant 0.000000e+00 : f32
    %14 = vector.broadcast %cst_11 : f32 to vector<16x32xf32>
    %15 = arith.maximumf %13, %14 : vector<16x32xf32>
    %16 = arith.truncf %15 : vector<16x32xf32> to vector<16x32xbf16>
    %c0_12 = arith.constant 0 : index
    %c0_13 = arith.constant 0 : index
    %17 = vector.load %arg6[%c0_12, %c0_13] : memref<32x128xbf16, #tpu.memory_space<vmem>>, vector<32x128xbf16>
    %cst_14 = arith.constant dense<0.000000e+00> : vector<16x128xf32>
    %18 = tpu.matmul %16, %17, %cst_14 {dimension_numbers = #tpu.dot_dimension_numbers<[1], [0], [0], [1], [0, 0, 1, 1], [], []>} : vector<16x32xbf16>, vector<32x128xbf16>, vector<16x128xf32> -> vector<16x128xf32>
    %c0_15 = arith.constant 0 : index
    %c0_16 = arith.constant 0 : index
    %19 = vector.load %arg7[%c0_15, %c0_16] : memref<1x128xf32, #tpu.memory_space<vmem>>, vector<1x128xf32>
    %20 = vector.broadcast %19 : vector<1x128xf32> to vector<16x128xf32>
    %21 = arith.addf %18, %20 : vector<16x128xf32>
    %22 = arith.negf %21 : vector<16x128xf32>
    %23 = math.exp %22 : vector<16x128xf32>
    %cst_17 = arith.constant 1.000000e+00 : f32
    %24 = vector.broadcast %cst_17 : f32 to vector<16x128xf32>
    %25 = arith.addf %24, %23 : vector<16x128xf32>
    %26 = arith.divf %24, %25 : vector<16x128xf32>
    %cst_18 = arith.constant 2.000000e+00 : f32
    %27 = vector.broadcast %cst_18 : f32 to vector<16x128xf32>
    %28 = arith.mulf %27, %26 : vector<16x128xf32>
    %cst_19 = arith.constant -1.000000e+00 : f32
    %29 = vector.broadcast %cst_19 : f32 to vector<16x128xf32>
    %30 = arith.addf %28, %29 : vector<16x128xf32>
    %c0_20 = arith.constant 0 : index
    %c0_21 = arith.constant 0 : index
    %31 = vector.load %arg8[%c0_20, %c0_21] : memref<16x128xf32, #tpu.memory_space<vmem>>, vector<16x128xf32>
    tpu.vector_store %arg8[%c0_20, %c0_21], %30 {strides = array<i32>} : memref<16x128xf32, #tpu.memory_space<vmem>>, vector<16x128xf32>,
    return
  }
  func.func @transform_0(%arg0: i32) -> (i32, i32) {
    %c0_i32 = arith.constant 0 : i32
    %c0_i32_0 = arith.constant 0 : i32
    return %arg0, %c0_i32 : i32, i32
  }
  func.func @transform_1(%arg0: i32) -> (i32, i32) {
    %c0_i32 = arith.constant 0 : i32
    %c0_i32_0 = arith.constant 0 : i32
    %c0_i32_1 = arith.constant 0 : i32
    return %c0_i32, %c0_i32_0 : i32, i32
  }
  func.func @transform_2(%arg0: i32) -> (i32, i32) {
    %c0_i32 = arith.constant 0 : i32
    %c0_i32_0 = arith.constant 0 : i32
    %c0_i32_1 = arith.constant 0 : i32
    return %c0_i32, %c0_i32_0 : i32, i32
  }
  func.func @transform_3(%arg0: i32) -> (i32, i32) {
    %c0_i32 = arith.constant 0 : i32
    %c0_i32_0 = arith.constant 0 : i32
    %c0_i32_1 = arith.constant 0 : i32
    return %c0_i32, %c0_i32_0 : i32, i32
  }
  func.func @transform_4(%arg0: i32) -> (i32, i32) {
    %c0_i32 = arith.constant 0 : i32
    %c0_i32_0 = arith.constant 0 : i32
    %c0_i32_1 = arith.constant 0 : i32
    return %c0_i32, %c0_i32_0 : i32, i32
  }
  func.func @transform_5(%arg0: i32) -> (i32, i32) {
    %c0_i32 = arith.constant 0 : i32
    %c0_i32_0 = arith.constant 0 : i32
    %c0_i32_1 = arith.constant 0 : i32
    return %c0_i32, %c0_i32_0 : i32, i32
  }
  func.func @transform_6(%arg0: i32) -> (i32, i32) {
    %c0_i32 = arith.constant 0 : i32
    %c0_i32_0 = arith.constant 0 : i32
    %c0_i32_1 = arith.constant 0 : i32
    return %c0_i32, %c0_i32_0 : i32, i32
  }
  func.func @transform_7(%arg0: i32) -> (i32, i32) {
    %c0_i32 = arith.constant 0 : i32
    %c0_i32_0 = arith.constant 0 : i32
    return %arg0, %c0_i32 : i32, i32
  }
}

</mosaic_0001>

<bundles_post_ra>
// kernel: tpu_custom_call.1
= control target key start
LH: loop header
LB: loop body
LE: loop exit
PB: predicated region body
PF: predicated region fallthrough
CT: control target
= control target key end

     0   :  { %12 = vsyncpa [#allocation3], 0  ;;  %s619_s0 = inlined_call_operand.hbm [shape: bf16[16,32], index: 0, kind: input, shape index: {}]   ;;  %s620_s1 = inlined_call_operand.hbm [shape: bf16[32,32], index: 1, kind: input, shape index: {}]   ;;  %s621_s2 = inlined_call_operand.vmem [shape: f32[1,32], index: 2, kind: input, shape index: {}]   ;;  %s622_s3 = inlined_call_operand.hbm [shape: bf16[32,32], index: 3, kind: input, shape index: {}]   ;;  %s623_s4 = inlined_call_operand.vmem [shape: f32[1,32], index: 4, kind: input, shape index: {}]   ;;  %s624_s5 = inlined_call_operand.vmem [shape: bf16[32,128], index: 5, kind: input, shape index: {}]   ;;  %s625_s6 = inlined_call_operand.vmem [shape: f32[1,128], index: 6, kind: input, shape index: {}]   ;;  %s626_s7 = inlined_call_operand.hbm [shape: f32[16,128], index: 7, kind: output, shape index: {}]  }
   0x1   :  { %13 = vsyncpa [#allocation6], 0 }
   0x2   :  { %14 = vsyncpa [#allocation4], 0  ;;  %s487_s24 = smov [#allocation5]   ;;  %s488_s26 = smov [#allocation2]  }
   0x3   :  { %s32_s25 = sshll.u32 %s487_s24, 4  ;;  %s20_s27 = sshll.u32 %s488_s26, 4  ;;  %s33_s25 = int_to_ptr.vmem [resolvable:$true] %s32_s25  ;;  %s537_s27 = int_to_ptr.vmem [resolvable:$true] %s20_s27 }
   0x4   :  { %s393_s30 = scalar_lea.hbm %s620_s1, 256 }
   0x5   :  { %p394_p0 = scmp.ne.s32.totalorder %s620_s1, %s393_s30  ;;  %p397_p1 = scmp.lt.u32.totalorder %s393_s30, %s620_s1 }
   0x7   :  { %p399_p2 = pnand %p397_p1, %p394_p0 }
   0x9   :  { %402 = shalt.err (!%p399_p2)
}
   0xa   :  { %s403_s12 = scalar_lea.vmem %s33_s25, 256  ;;  %p408_p4 = scmp.lt.s32.totalorder %s33_s25, %s33_s25 }
   0xb   :  { %p404_p3 = scmp.ne.s32.totalorder %s33_s25, %s403_s12  ;;  %p409_p5 = scmp.lt.s32.totalorder %s403_s12, %s403_s12 }
   0xd   :  { %p410_p6 = por %p409_p5, %p408_p4 }
   0xf   :  { %p411_p7 = pnand %p410_p6, %p404_p3 }
  0x11   :  { %414 = shalt.err (!%p411_p7)
}
  0x12   :  { %s489_s13 = smov 64   ;;  %s490_s14 = smov 4  }
  0x13   :  { %38 = dma.hbm_to_vmem [thread:$0]  %s620_s1, 256, %s33_s25, [#allocation6], %s489_s13, %s489_s13, %s490_s14  }
  0x14   :  { %s415_s19 = scalar_lea.hbm %s619_s0, 128 }
  0x15   :  { %p416_p8 = scmp.ne.s32.totalorder %s619_s0, %s415_s19  ;;  %p419_p9 = scmp.lt.u32.totalorder %s415_s19, %s619_s0 }
  0x17   :  { %p421_p10 = pnand %p419_p9, %p416_p8 }
  0x19   :  { %424 = shalt.err (!%p421_p10)
}
  0x1a   :  { %s425_s24 = scalar_lea.vmem %s537_s27, 128  ;;  %p430_p12 = scmp.lt.s32.totalorder %s537_s27, %s537_s27 }
  0x1b   :  { %p426_p11 = scmp.ne.s32.totalorder %s537_s27, %s425_s24  ;;  %p431_p13 = scmp.lt.s32.totalorder %s425_s24, %s425_s24 }
  0x1d   :  { %p432_p0 = por %p431_p13, %p430_p12 }
  0x1f   :  { %p433_p1 = pnand %p432_p0, %p426_p11 }
  0x21   :  { %436 = shalt.err (!%p433_p1)
}
  0x22   :  { %26 = dma.hbm_to_vmem [thread:$0]  %s619_s0, 128, %s537_s27, [#allocation3], %s489_s13, %s489_s13, %s490_s14  }
  0x23   :  { %s491_s26 = smov [#allocation7]   ;;  %s437_s8 = scalar_lea.hbm %s622_s3, 256 }
  0x24   :  { %s46_s28 = sshll.u32 %s491_s26, 4  ;;  %p438_p2 = scmp.ne.s32.totalorder %s622_s3, %s437_s8  ;;  %s47_s28 = int_to_ptr.vmem [resolvable:$true] %s46_s28 }
  0x25   :  { %p441_p3 = scmp.lt.u32.totalorder %s437_s8, %s622_s3 }
  0x27   :  { %p443_p4 = pnand %p441_p3, %p438_p2 }
  0x29   :  { %446 = shalt.err (!%p443_p4)
}
  0x2a   :  { %s447_s15 = scalar_lea.vmem %s47_s28, 256  ;;  %p452_p6 = scmp.lt.s32.totalorder %s47_s28, %s47_s28 }
  0x2b   :  { %p448_p5 = scmp.ne.s32.totalorder %s47_s28, %s447_s15  ;;  %p453_p7 = scmp.lt.s32.totalorder %s447_s15, %s447_s15 }
  0x2d   :  { %p454_p8 = por %p453_p7, %p452_p6 }
  0x2f   :  { %p455_p9 = pnand %p454_p8, %p448_p5 }
  0x31   :  { %458 = shalt.err (!%p455_p9)
}
  0x32   :  { %52 = dma.hbm_to_vmem [thread:$0]  %s622_s3, 256, %s47_s28, [#allocation6], %s489_s13, %s489_s13, %s490_s14  }
  0x33   :  { %481 = dma.done.wait [#allocation3], 128  }
  0x34   :  { %482 = vsyncadd [#allocation3], 4294967168 }
  0x35   :  { %483 = dma.done.wait [#allocation6], 512  }
  0x36   :  { %484 = vsyncadd [#allocation6], 4294966784  ;;  %v492_v0 = vmov 0.0   ;;  %vm493_vm0 = vmmov 0   ;;  %v378_v1 = vld [vmem:[#allocation5] sm:$0xff]   ;;  %v379_v2 = vld [vmem:[#allocation5 + $0x8] sm:$0xff]  }
  0x37   :  { %344 = vmatprep.subr.bf16.mxu0 %v492_v0  ;;  %348 = vmatprep.mubr.msk.bf16.mxu0 %vm493_vm0, %v492_v0  ;;  %v380_v3 = vld [vmem:[#allocation2] sm:$0xff]   ;;  %vm99_vm1 = vcmask 261120   ;;  %v381_v4 = vld [vmem:[#allocation7] sm:$0xff]   ;;  %v320_v6 = vld [vmem:[%s621_s2] ss:$0 sm:$0xff] }
  0x38   :  { %352 = vmatprep.subr.bf16.mxu1 %v492_v0  ;;  %356 = vmatprep.mubr.msk.bf16.mxu1 %vm493_vm0, %v492_v0  ;;  %v382_v5 = vld [vmem:[#allocation7 + $0x8] sm:$0xff]   ;;  %v383_v16 = vld [vmem:[%s624_s5] sm:$0xff]   ;;  %v384_v17 = vld [vmem:[%s624_s5 + $0x8] sm:$0xff]  }
  0x39   :  { %345 = vmatpush3.bf16.msra.mxu0 %v378_v1  ;;  %353 = vmatpush3.bf16.msra.mxu1 %v381_v4  ;;  %v325_v18 = vld [vmem:[%s623_s4] ss:$0 sm:$0xff]  ;;  %s494_s4 = smov [#allocation8]  }
  0x3a   :  { %346 = vmatprep.subr.bf16.mxu0 %v492_v0  ;;  %354 = vmatprep.subr.bf16.mxu1 %v492_v0  ;;  %v329_v28 = vld [vmem:[%s625_s6] ss:$0 sm:$0xff]  ;;  %s307_s5 = sshll.u32 %s494_s4, 4  ;;  %s308_s5 = int_to_ptr.vmem [resolvable:$true] %s307_s5 }
  0x3b   :  { %s459_s6 = scalar_lea.vmem %s308_s5, 256  ;;  %p464_p11 = scmp.lt.s32.totalorder %s308_s5, %s308_s5 }
  0x3c   :  { %p460_p10 = scmp.ne.s32.totalorder %s308_s5, %s459_s6  ;;  %p465_p12 = scmp.lt.s32.totalorder %s459_s6, %s459_s6 }
  0x3d   :  { %347 = vmatpush3.bf16.msra.mxu0 %v379_v2  ;;  %355 = vmatpush3.bf16.msra.mxu1 %v382_v5 }
  0x3e   :  { %360 = vmatprep.subr.bf16.mxu0 %v492_v0  ;;  %p466_p13 = por %p465_p12, %p464_p11 }
  0x40   :  { %349 = vmatmul.mubr.msk.bf16.vlgmr.msra.gmra.mrb[0].mxu0 %vm99_vm1, %v380_v3  ;;  %p467_p0 = pnand %p466_p13, %p460_p10 }
  0x41   :  { %364 = vmatprep.mubr.msk.bf16.mxu0 %vm493_vm0, %v492_v0  ;;  %361 = vmatpush3.bf16.msra.mxu0 %v383_v16 }
  0x42   :  { %362 = vmatprep.subr.bf16.mxu0 %v492_v0 }
  0x45   :  { %363 = vmatpush3.bf16.msra.mxu0 %v384_v17 }
 0x113   :  { %v137_v7 = vpop.f32.mrb[0].mxu0 }
 0x114   :  { %v138_v8 = vadd.f32 %v320_v6, %v137_v7  ;;  %v350_v9 = vpop.f32.mrb[1].mxu0 }
 0x115   :  { %v140_v10 = vpop.f32.mrb[2].mxu0 }
 0x116   :  { %v141_v11 = vadd.f32 %v320_v6, %v140_v10  ;;  %v351_v12 = vpop.f32.mrb[3].mxu0  ;;  %v144_v13 = vmax.f32 %v138_v8, 0.0 }
 0x118   :  { %v145_v14 = vmax.f32 %v141_v11, 0.0 }
 0x11a   :  { %v146_v15 = vpack.c.bf16 %v145_v14, %v144_v13 }
 0x11c   :  { %357 = vmatmul.mubr.msk.bf16.vlgmr.msra.gmra.mrb[0].mxu1 %vm99_vm1, %v146_v15 }
 0x1ef   :  { %v207_v19 = vpop.f32.mrb[0].mxu1 }
 0x1f0   :  { %v208_v20 = vadd.f32 %v325_v18, %v207_v19  ;;  %v358_v21 = vpop.f32.mrb[1].mxu1 }
 0x1f1   :  { %v210_v22 = vpop.f32.mrb[2].mxu1 }
 0x1f2   :  { %v211_v23 = vadd.f32 %v325_v18, %v210_v22  ;;  %v359_v24 = vpop.f32.mrb[3].mxu1  ;;  %v214_v25 = vmax.f32 %v208_v20, 0.0 }
 0x1f4   :  { %v215_v26 = vmax.f32 %v211_v23, 0.0 }
 0x1f6   :  { %v216_v27 = vpack.c.bf16 %v215_v26, %v214_v25 }
 0x1f8   :  { %365 = vmatmul.mubr.msk.bf16.vlgmr.msra.gmra.mrb[4].mxu0 %vm99_vm1, %v216_v27 }
 0x2cb   :  { %v277_v29 = vpop.f32.mrb[4].mxu0 }
 0x2cc   :  { %v278_v30 = vadd.f32 %v329_v28, %v277_v29  ;;  %v366_v31 = vpop.f32.mrb[5].mxu0 }
 0x2cd   :  { %v280_v32 = vpop.f32.mrb[6].mxu0 }
 0x2ce   :  { %v333_v33 = vmul.f32 -1.442695, %v278_v30  ;;  %v281_v34 = vadd.f32 %v329_v28, %v280_v32  ;;  %v367_v35 = vpop.f32.mrb[7].mxu0 }
 0x2d0   :  { %385 = vpow2.f32 %v333_v33  ;;  %v334_v36 = vmul.f32 -1.442695, %v281_v34 }
 0x2d2   :  { %387 = vpow2.f32 %v334_v36 }
 0x2da   :  { %v386_v37 = vpop.eup %385 }
 0x2db   :  { %v290_v38 = vadd.f32 1.0, %v386_v37 }
 0x2dc   :  { %v388_v39 = vpop.eup %387 }
 0x2dd   :  { %389 = vrcp.f32 %v290_v38  ;;  %v291_v40 = vadd.f32 1.0, %v388_v39 }
 0x2df   :  { %391 = vrcp.f32 %v291_v40 }
 0x2e7   :  { %v390_v41 = vpop.eup %389 }
 0x2e8   :  { %v296_v42 = vmul.f32 2.0, %v390_v41 }
 0x2e9   :  { %v392_v43 = vpop.eup %391 }
 0x2ea   :  { %v298_v44 = vadd.f32 -1.0, %v296_v42  ;;  %v297_v45 = vmul.f32 2.0, %v392_v43 }
 0x2ec   :  { %300 = vst [vmem:[#allocation8] sm:$0xff] %v298_v44  ;;  %v299_v46 = vadd.f32 -1.0, %v297_v45 }
 0x2ee   :  { %301 = vst [vmem:[#allocation8 + $0x8] sm:$0xff] %v299_v46 }
 0x2ef   :  { %470 = shalt.err (!%p467_p0)
}
 0x2f0   :  { %s471_s24 = scalar_lea.hbm %s626_s7, 256 }
 0x2f1   :  { %p472_p1 = scmp.ne.s32.totalorder %s626_s7, %s471_s24  ;;  %p475_p2 = scmp.lt.u32.totalorder %s471_s24, %s626_s7 }
 0x2f3   :  { %p477_p3 = pnand %p475_p2, %p472_p1 }
 0x2f5   :  { %480 = shalt.err (!%p477_p3)
}
 0x2f6   :  { %s495_s29 = smov 128   ;;  %s496_s30 = smov 8  }
 0x2f7   :  { %313 = dma.vmem_to_hbm [thread:$0]  %s308_s5, 256, %s626_s7, [#allocation4], %s495_s29, %s495_s29, %s496_s30  }
 0x2f8   :  { %485 = dma.done.wait [#allocation4], 256  }
 0x2f9   :  { %486 = vsyncadd [#allocation4], 4294967040 }
 0x2fa   :  { %317 = vsyncpa [#allocation3], 1 }
 0x2fb   :  { %318 = vsyncpa [#allocation6], 1 }
 0x2fc   :  { %319 = vsyncpa [#allocation4], 1 }

</bundles_post_ra>
